<compile_context>
chip_gen: v7x
topology: tpu7x:2x2x1
jax: 0.10.0
libtpu: 0.0.40
codegen_flags: <defaults>
</compile_context>

<pallas_src>
import functools

import jax
import jax.numpy as jnp
import numpy as np
from jax.experimental import pallas as pl
from jax.experimental.pallas import tpu as pltpu


# ---------------------------------------------------------------------------
# Parameter construction (deterministic, mirrors Embedding.__init__)
# ---------------------------------------------------------------------------
def make_pos_encoding(max_len: int, d_model: int) -> jnp.ndarray:
    """Same formula as Embedding._make_pos_encoding (vectorized)."""
    pos = np.arange(max_len, dtype=np.float64)[:, None]           # (L, 1)
    i_even = np.arange(0, d_model, 2, dtype=np.float64)[None, :]  # (1, ceil(D/2))
    angle = pos / np.power(10000.0, i_even / d_model)              # (L, ceil(D/2))
    pe = np.zeros((max_len, d_model), dtype=np.float64)
    pe[:, 0::2] = np.sin(angle)
    n_odd = pe[:, 1::2].shape[1]
    pe[:, 1::2] = np.cos(angle[:, :n_odd])
    return jnp.asarray(pe, dtype=jnp.float32)


def make_embedding_table(key, vocab_size: int, embedding_dim: int, pad_idx: int = 0):
    """nn.Embedding default init: N(0,1), with padding_idx row zeroed."""
    w = jax.random.normal(key, (vocab_size, embedding_dim), dtype=jnp.float32)
    return w.at[pad_idx].set(0.0)


# ---------------------------------------------------------------------------
# Pallas kernel: one grid step = one tile of `tile` tokens (flattened B*S axis)
#   ids_ref : (B*S_pad,) int32 token ids, scalar-prefetched into SMEM
#   pos_ref : (tile, D)  positional rows for this sequence tile (pipelined)
#   emb_hbm : (V, D)     full embedding table, left in HBM (pl.ANY)
#   out_ref : (tile, D)  output tile
#   buf     : (2, tile, D) VMEM gather scratch (double-buffered across steps)
#   sems    : (2,) DMA semaphores, one per buffer slot
# ---------------------------------------------------------------------------
def _embed_gather_kernel(ids_ref, pos_ref, emb_hbm, out_ref, buf, sems, *, tile):
    t = pl.program_id(0)
    n = pl.num_programs(0)
    slot = jax.lax.rem(t, 2)

    def start_gather(tile_idx, slot_idx):
        base = tile_idx * tile

        def body(i, carry):
            tok = ids_ref[base + i]                       # scalar read from SMEM
            pltpu.make_async_copy(emb_hbm.at[tok],        # (D,) HBM row
                                  buf.at[slot_idx, i],    # (D,) VMEM row
                                  sems.at[slot_idx]).start()
            return carry

        jax.lax.fori_loop(0, tile, body, 0)

    def wait_gather(slot_idx):
        def body(i, carry):
            # Each wait consumes exactly one row-copy's worth of signal.
            pltpu.make_async_copy(emb_hbm.at[0], buf.at[slot_idx, 0],
                                  sems.at[slot_idx]).wait()
            return carry

        jax.lax.fori_loop(0, tile, body, 0)

    # Prime the pipeline: gather tile 0 into slot 0 on the first step.
    @pl.when(t == 0)
    def _():
        start_gather(0, 0)

    # Prefetch the next tile's rows into the other slot while this tile lands.
    @pl.when(t + 1 < n)
    def _():
        start_gather(t + 1, 1 - slot)

    wait_gather(slot)
    out_ref[...] = (buf[slot] + pos_ref[...]).astype(out_ref.dtype)


# ---------------------------------------------------------------------------
# Wrapper: token_emb = emb_table[input_ids]; out = token_emb + pos_encoding[:S]
# ---------------------------------------------------------------------------
def _round_up(x: int, m: int) -> int:
    return (x + m - 1) // m * m


def embedding_forward(input_ids, emb_table, pos_encoding, tokens_per_tile: int = 512):
    B, S = input_ids.shape
    V, D = emb_table.shape
    max_len = pos_encoding.shape[0]
    assert S <= max_len, "sequence length exceeds positional-encoding max_len"

    # Token tile: multiple of 8 (sublane-dense), capped; S is padded up to a
    # multiple of it so each tile lies inside one batch row.
    tile = _round_up(min(tokens_per_tile, _round_up(S, 8)), 8)
    S_pad = _round_up(S, tile)
    n_seq_tiles = S_pad // tile
    n_tiles = B * n_seq_tiles

    ids = input_ids.astype(jnp.int32)
    if S_pad != S:
        ids = jnp.pad(ids, ((0, 0), (0, S_pad - S)))       # pad with id 0 (valid row)
    ids_flat = ids.reshape(B * S_pad)                       # flattened token axis

    pos = pos_encoding[:S].astype(emb_table.dtype)
    if S_pad != S:
        pos = jnp.pad(pos, ((0, S_pad - S), (0, 0)))        # (S_pad, D)

    # VMEM budget: 2x pos blocks + 2x out blocks (pipeline double-buffering)
    # + (2, tile, D) gather scratch + slack for Mosaic internals.
    block_bytes = tile * D * jnp.dtype(emb_table.dtype).itemsize
    vmem_limit = min(max(6 * block_bytes + (4 << 20), 16 << 20), 48 << 20)

    kernel = functools.partial(_embed_gather_kernel, tile=tile)

    out_flat = pl.pallas_call(
        kernel,
        out_shape=jax.ShapeDtypeStruct((B * S_pad, D), emb_table.dtype),
        grid_spec=pltpu.PrefetchScalarGridSpec(
            num_scalar_prefetch=1,              # ids_flat -> SMEM
            grid=(n_tiles,),
            in_specs=[
                # Positional rows for this sequence tile (blocked, pipelined).
                pl.BlockSpec((tile, D), lambda t, ids: (t % n_seq_tiles, 0)),
                # Embedding table stays in HBM; rows DMA-gathered in-kernel.
                pl.BlockSpec(memory_space=pl.ANY),
            ],
            out_specs=pl.BlockSpec((tile, D), lambda t, ids: (t, 0)),
            scratch_shapes=[
                pltpu.VMEM((2, tile, D), emb_table.dtype),
                pltpu.SemaphoreType.DMA((2,)),
            ],
        ),
        compiler_params=pltpu.CompilerParams(
            # Cross-step gather prefetch carries scratch state -> sequential.
            dimension_semantics=("arbitrary",),
            vmem_limit_bytes=int(vmem_limit),
        ),
    )(ids_flat, pos, emb_table)

    out = out_flat.reshape(B, S_pad, D)
    return out[:, :S, :] if S_pad != S else out


# ---------------------------------------------------------------------------
# Demo / correctness check
# ---------------------------------------------------------------------------
if __name__ == "__main__":
    vocab_size = 64
    embedding_dim = 128
    max_len = 32
    pad_idx = 0
    B, S = 2, 13   # non-multiple of 8 to exercise the padding / slicing path

    key = jax.random.PRNGKey(0)
    k_emb, k_ids = jax.random.split(key)

    emb_table = make_embedding_table(k_emb, vocab_size, embedding_dim, pad_idx)
    pos_encoding = make_pos_encoding(max_len, embedding_dim)

    input_ids = jax.random.randint(k_ids, (B, S), 0, vocab_size, dtype=jnp.int32)
    input_ids = input_ids.at[0, 0].set(pad_idx)   # exercise the padding index too

    # tokens_per_tile=8 so the small demo exercises multiple tiles and both
    # gather-buffer slots (grid of 4 steps).
    out = embedding_forward(input_ids, emb_table, pos_encoding, tokens_per_tile=8)
    out = jax.block_until_ready(out)

    # Pure-JAX reference (matches the PyTorch forward semantics).
    ref = emb_table[input_ids] + pos_encoding[:S][None, :, :]
    assert out.shape == (B, S, embedding_dim)
    assert out.dtype == jnp.float32
    np.testing.assert_allclose(np.asarray(out), np.asarray(ref), rtol=1e-6, atol=1e-6)

    print("KERNEL_OK")
</pallas_src>

<mosaic_0001>
module attributes {stable_mosaic.version = 11 : i64} {
  func.func @_embed_gather_kernel(%arg0: i32, %arg1: memref<32xi32, #tpu.memory_space<smem>>, %arg2: memref<8x128xf32, #tpu.memory_space<vmem>>, %arg3: memref<64x128xf32, #tpu.memory_space<any>>, %arg4: memref<8x128xf32, #tpu.memory_space<vmem>>, %arg5: memref<2x8x128xf32, #tpu.memory_space<vmem>>, %arg6: memref<2x!tpu.dma_semaphore, #tpu.memory_space<semaphore_mem>>) attributes {dimension_semantics = [#tpu.dimension_semantics<arbitrary>], iteration_bounds = array<i64: 4>, scalar_prefetch = 1 : i64, scratch_operands = 2 : i64, tpu.core_type = #tpu.core_type<tc>, window_params = [{transform_indices = @transform_0, window_bounds = array<i64: 8, 128>}, {}, {transform_indices = @transform_2, window_bounds = array<i64: 8, 128>}]} {
    %c2_i32 = arith.constant 2 : i32
    %0 = arith.remsi %arg0, %c2_i32 : i32
    %c0_i32 = arith.constant 0 : i32
    %1 = arith.cmpi eq, %arg0, %c0_i32 : i32
    %2 = arith.extui %1 : i1 to i32
    %c0_i32_0 = arith.constant 0 : i32
    %3 = arith.cmpi ne, %2, %c0_i32_0 : i32
    scf.if %3 {
      %c0_i32_9 = arith.constant 0 : i32
      %c8_i32_10 = arith.constant 8 : i32
      %15 = arith.addi %c0_i32_9, %c8_i32_10 : i32
      %c1_i32_11 = arith.constant 1 : i32
      scf.for %arg7 = %c0_i32_9 to %15 step %c1_i32_11  : i32 {
        %c0_i32_13 = arith.constant 0 : i32
        %16 = arith.addi %c0_i32_13, %arg7 : i32
        %17 = arith.index_cast %16 : i32 to index
        %18 = memref.load %arg1[%17] : memref<32xi32, #tpu.memory_space<smem>>
        %c0_i32_14 = arith.constant 0 : i32
        %c0_i32_15 = arith.constant 0 : i32
        %c0_i32_16 = arith.constant 0 : i32
        %19 = tpu.memref_slice %arg3[%18, %c0_i32_16] : memref<64x128xf32, #tpu.memory_space<any>> -> memref<1x128xf32, #tpu.memory_space<any>>
        %20 = tpu.memref_squeeze %19 : memref<1x128xf32, #tpu.memory_space<any>> -> memref<128xf32, #tpu.memory_space<any>>
        %c0_i32_17 = arith.constant 0 : i32
        %21 = tpu.memref_slice %arg5[%c0_i32_14, %arg7, %c0_i32_17] : memref<2x8x128xf32, #tpu.memory_space<vmem>> -> memref<1x1x128xf32, #tpu.memory_space<vmem>>
        %22 = tpu.memref_squeeze %21 : memref<1x1x128xf32, #tpu.memory_space<vmem>> -> memref<128xf32, #tpu.memory_space<vmem>>
        %23 = tpu.memref_slice %arg6[%c0_i32_15] : memref<2x!tpu.dma_semaphore, #tpu.memory_space<semaphore_mem>> -> memref<1x!tpu.dma_semaphore, #tpu.memory_space<semaphore_mem>>
        %24 = tpu.memref_squeeze %23 : memref<1x!tpu.dma_semaphore, #tpu.memory_space<semaphore_mem>> -> memref<!tpu.dma_semaphore, #tpu.memory_space<semaphore_mem>>
        tpu.enqueue_dma source(%20 : memref<128xf32, #tpu.memory_space<any>>) target(%22 : memref<128xf32, #tpu.memory_space<vmem>>) target_semaphore(%24 : memref<!tpu.dma_semaphore, #tpu.memory_space<semaphore_mem>>)
      }
      %c8_i32_12 = arith.constant 8 : i32
    } else {
    }
    %c1_i32 = arith.constant 1 : i32
    %4 = arith.addi %arg0, %c1_i32 : i32
    %c4_i32 = arith.constant 4 : i32
    %5 = arith.cmpi slt, %4, %c4_i32 : i32
    %6 = arith.extui %5 : i1 to i32
    %c0_i32_1 = arith.constant 0 : i32
    %7 = arith.cmpi ne, %6, %c0_i32_1 : i32
    scf.if %7 {
      %c1_i32_9 = arith.constant 1 : i32
      %15 = arith.addi %arg0, %c1_i32_9 : i32
      %c1_i32_10 = arith.constant 1 : i32
      %16 = arith.subi %c1_i32_10, %0 : i32
      %c8_i32_11 = arith.constant 8 : i32
      %17 = arith.muli %15, %c8_i32_11 : i32
      %c0_i32_12 = arith.constant 0 : i32
      %c8_i32_13 = arith.constant 8 : i32
      %18 = arith.addi %c0_i32_12, %c8_i32_13 : i32
      %c1_i32_14 = arith.constant 1 : i32
      scf.for %arg7 = %c0_i32_12 to %18 step %c1_i32_14  : i32 {
        %19 = arith.addi %17, %arg7 : i32
        %20 = arith.index_cast %19 : i32 to index
        %21 = memref.load %arg1[%20] : memref<32xi32, #tpu.memory_space<smem>>
        %c0_i32_16 = arith.constant 0 : i32
        %22 = tpu.memref_slice %arg3[%21, %c0_i32_16] : memref<64x128xf32, #tpu.memory_space<any>> -> memref<1x128xf32, #tpu.memory_space<any>>
        %23 = tpu.memref_squeeze %22 : memref<1x128xf32, #tpu.memory_space<any>> -> memref<128xf32, #tpu.memory_space<any>>
        %c0_i32_17 = arith.constant 0 : i32
        %24 = tpu.memref_slice %arg5[%16, %arg7, %c0_i32_17] : memref<2x8x128xf32, #tpu.memory_space<vmem>> -> memref<1x1x128xf32, #tpu.memory_space<vmem>>
        %25 = tpu.memref_squeeze %24 : memref<1x1x128xf32, #tpu.memory_space<vmem>> -> memref<128xf32, #tpu.memory_space<vmem>>
        %26 = tpu.memref_slice %arg6[%16] : memref<2x!tpu.dma_semaphore, #tpu.memory_space<semaphore_mem>> -> memref<1x!tpu.dma_semaphore, #tpu.memory_space<semaphore_mem>>
        %27 = tpu.memref_squeeze %26 : memref<1x!tpu.dma_semaphore, #tpu.memory_space<semaphore_mem>> -> memref<!tpu.dma_semaphore, #tpu.memory_space<semaphore_mem>>
        tpu.enqueue_dma source(%23 : memref<128xf32, #tpu.memory_space<any>>) target(%25 : memref<128xf32, #tpu.memory_space<vmem>>) target_semaphore(%27 : memref<!tpu.dma_semaphore, #tpu.memory_space<semaphore_mem>>)
      }
      %c8_i32_15 = arith.constant 8 : i32
    } else {
    }
    %c0_i32_2 = arith.constant 0 : i32
    %c8_i32 = arith.constant 8 : i32
    %8 = arith.addi %c0_i32_2, %c8_i32 : i32
    %c1_i32_3 = arith.constant 1 : i32
    scf.for %arg7 = %c0_i32_2 to %8 step %c1_i32_3  : i32 {
      %c0_i32_9 = arith.constant 0 : i32
      %c0_i32_10 = arith.constant 0 : i32
      %c0_i32_11 = arith.constant 0 : i32
      %15 = tpu.memref_slice %arg3[%c0_i32_9, %c0_i32_11] : memref<64x128xf32, #tpu.memory_space<any>> -> memref<1x128xf32, #tpu.memory_space<any>>
      %16 = tpu.memref_squeeze %15 : memref<1x128xf32, #tpu.memory_space<any>> -> memref<128xf32, #tpu.memory_space<any>>
      %c0_i32_12 = arith.constant 0 : i32
      %17 = tpu.memref_slice %arg5[%0, %c0_i32_10, %c0_i32_12] : memref<2x8x128xf32, #tpu.memory_space<vmem>> -> memref<1x1x128xf32, #tpu.memory_space<vmem>>
      %18 = tpu.memref_squeeze %17 : memref<1x1x128xf32, #tpu.memory_space<vmem>> -> memref<128xf32, #tpu.memory_space<vmem>>
      %19 = tpu.memref_slice %arg6[%0] : memref<2x!tpu.dma_semaphore, #tpu.memory_space<semaphore_mem>> -> memref<1x!tpu.dma_semaphore, #tpu.memory_space<semaphore_mem>>
      %20 = tpu.memref_squeeze %19 : memref<1x!tpu.dma_semaphore, #tpu.memory_space<semaphore_mem>> -> memref<!tpu.dma_semaphore, #tpu.memory_space<semaphore_mem>>
      tpu.wait_dma2 semaphore(%20 : memref<!tpu.dma_semaphore, #tpu.memory_space<semaphore_mem>>) src(%16 : memref<128xf32, #tpu.memory_space<any>>) dst(%18 : memref<128xf32, #tpu.memory_space<vmem>>)
    }
    %9 = arith.index_cast %0 : i32 to index
    %c0 = arith.constant 0 : index
    %c0_4 = arith.constant 0 : index
    %10 = vector.load %arg5[%9, %c0, %c0_4] : memref<2x8x128xf32, #tpu.memory_space<vmem>>, vector<1x8x128xf32>
    %11 = vector.shape_cast %10 : vector<1x8x128xf32> to vector<8x128xf32>
    %c0_5 = arith.constant 0 : index
    %c0_6 = arith.constant 0 : index
    %12 = vector.load %arg2[%c0_5, %c0_6] : memref<8x128xf32, #tpu.memory_space<vmem>>, vector<8x128xf32>
    %13 = arith.addf %11, %12 : vector<8x128xf32>
    %c0_7 = arith.constant 0 : index
    %c0_8 = arith.constant 0 : index
    %14 = vector.load %arg4[%c0_7, %c0_8] : memref<8x128xf32, #tpu.memory_space<vmem>>, vector<8x128xf32>
    tpu.vector_store %arg4[%c0_7, %c0_8], %13 {strides = array<i32>} : memref<8x128xf32, #tpu.memory_space<vmem>>, vector<8x128xf32>,
    return
  }
  func.func @transform_0(%arg0: i32, %arg1: memref<32xi32, #tpu.memory_space<smem>>) -> (i32, i32) {
    %c2_i32 = arith.constant 2 : i32
    %c0_i32 = arith.constant 0 : i32
    %0 = arith.cmpi eq, %c2_i32, %c0_i32 : i32
    %c1_i32 = arith.constant 1 : i32
    %1 = arith.select %0, %c1_i32, %c2_i32 : i32
    %2 = arith.remsi %arg0, %1 : i32
    %c0_i32_0 = arith.constant 0 : i32
    %3 = arith.cmpi ne, %2, %c0_i32_0 : i32
    %c0_i32_1 = arith.constant 0 : i32
    %4 = arith.cmpi slt, %2, %c0_i32_1 : i32
    %c0_i32_2 = arith.constant 0 : i32
    %5 = arith.cmpi slt, %1, %c0_i32_2 : i32
    %6 = arith.xori %4, %5 : i1
    %7 = arith.andi %6, %3 : i1
    %8 = arith.addi %2, %1 : i32
    %9 = arith.select %7, %8, %2 : i32
    %c0_i32_3 = arith.constant 0 : i32
    %c0_i32_4 = arith.constant 0 : i32
    return %9, %c0_i32_3 : i32, i32
  }
  func.func @transform_2(%arg0: i32, %arg1: memref<32xi32, #tpu.memory_space<smem>>) -> (i32, i32) {
    %c0_i32 = arith.constant 0 : i32
    %c0_i32_0 = arith.constant 0 : i32
    return %arg0, %c0_i32 : i32, i32
  }
}

</mosaic_0001>

<bundles_post_ra>
// kernel: tpu_custom_call.1
= control target key start
LH: loop header
LB: loop body
LE: loop exit
PB: predicated region body
PF: predicated region fallthrough
CT: control target
= control target key end

     0   :  { %s1027_s0 = inlined_call_operand.hbm [shape: s32[32], index: 0, kind: input, shape index: {}]   ;;  %s1028_s1 = inlined_call_operand.hbm [shape: f32[16,128], index: 1, kind: input, shape index: {}]   ;;  %s1029_s2 = inlined_call_operand.hbm [shape: f32[64,128], index: 2, kind: input, shape index: {}]   ;;  %s1030_s3 = inlined_call_operand.hbm [shape: f32[32,128], index: 3, kind: output, shape index: {}]  }
   0x1   :  { %1036 = sst [smem:[#allocation26_spill]] %s1028_s1  ;;  %s516_s14 = scalar_lea.hbm %s1027_s0, 16 }
   0x2   :  { %p517_p0 = scmp.ne.s32.totalorder %s1027_s0, %s516_s14  ;;  %p520_p1 = scmp.lt.u32.totalorder %s516_s14, %s1027_s0 }
   0x4   :  { %p522_p2 = pnand %p520_p1, %p517_p0 }
   0x6   :  { %525 = shalt.err (!%p522_p2)  }
   0x7   :  { %s724_s19 = smov [#allocation5]  }
   0x8   :  { %9 = dma.hbm_to_smem %s1027_s0, 16, %s724_s19, [#allocation4] }
   0x9   :  { %672 = dma.done.wait [#allocation4], 16 }
   0xa   :  { %673 = vsyncadd [#allocation4], 4294967280 }
   0xb   :  { %11 = sfence }
   0xc   :  { %12 = vsyncpa [#allocation7], 0 }
   0xd   :  { %14 = vsyncpa [#allocation7 + $0x1], 0 }
   0xe   :  { %15 = vsyncpa [#allocation8], 0 }
   0xf   :  { %17 = vsyncpa [#allocation8 + $0x1], 0  ;;  %s761_s22 = smov 0   ;;  %s763_s23 = smov 0  }
  0x10   :  { %s765_s24 = smov 0   ;;  %s767_s25 = smov 0  }
  0x11   :  { %s769_s26 = smov 0   ;;  %s771_s27 = smov 0  }
  0x12   :  { %s773_s0 = smov 0  }
  0x13 LB: > { %1037 = sst [smem:[#allocation20_spill]] %s694_s24  ;;  %s797_s28 = sadd.s32 4294967295, %s710_s0   ;;  %s710_s0 = sphi %s773_s0, %s1065_s0   ;;  %s706_s27 = sphi %s771_s27, %s1062_s27   ;;  %s702_s26 = sphi %s769_s26, %s1061_s26   ;;  %s698_s25 = sphi %s767_s25, %s1060_s25   ;;  %s694_s24 = sphi %s765_s24, %s1059_s24   ;;  %s690_s23 = sphi %s763_s23, %s1064_s23   ;;  %s686_s22 = sphi %s761_s22, %s1063_s22  }
  0x14   : > { %1038 = sst [smem:[#allocation21_spill]] %s702_s26  ;;  %s388_s29 = sadd.s32 4294967294, %s710_s0  }
  0x15   : > { %1039 = sst [smem:[#allocation22_spill]] %s706_s27  ;;  %s801_s30 = sadd.s32 1, %s710_s0  }
  0x16   : > { %p27_p3 = scmp.lt.s32.totalorder %s710_s0, 0  ;;  %s28_s4 = ssub.s32 0, %s710_s0 }
  0x17   : > { %p39_p4 = scmp.lt.s32.totalorder %s801_s30, 0  ;;  %s389_s5 = smin.u32 %s710_s0, %s28_s4 }
  0x18   : > { %s40_s6 = ssub.s32 0, %s801_s30  ;;  %s30_s7 = sand.u32 1, %s389_s5  }
  0x19   : > { %s392_s8 = smin.u32 %s40_s6, %s801_s30  ;;  %s31_s9 = ssub.s32 0, %s30_s7 }
  0x1a   : > { %s42_s10 = sand.u32 1, %s392_s8   ;;  %s1067_s9 = smov (!%p27_p3, %s31_s9), %s30_s7 }
  0x1b   : > { %s43_s11 = ssub.s32 0, %s42_s10  ;;  %s54_s12 = sadd.s32 1, %s706_s27 }
  0x1c   : > { %p391_p5 = scmp.lt.s32.totalorder %s1067_s9, 0  ;;  %s37_s13 = sadd.s32 2, %s1067_s9 }
  0x1d   : > { %s1069_s11 = smov (!%p39_p4, %s43_s11), %s42_s10  ;;  %p61_p7 = scmp.ne.s32.totalorder %s706_s27, %s702_s26 }
  0x1e   : > { %s1071_s13 = smov (!%p391_p5, %s37_s13), %s1067_s9  ;;  %p394_p6 = scmp.lt.s32.totalorder %s1069_s11, 0 }
  0x1f   : > { %s49_s14 = sadd.s32 2, %s1069_s11  ;;  %p62_p8 = scmp.eq.s32.totalorder %s710_s0, 0 }
  0x20   : > { %s1073_s14 = smov (!%p394_p6, %s49_s14), %s1069_s11  ;;  %p67_p10 = scmp.ne.s32.totalorder %s702_s26, %s698_s25 }
  0x21   : > { %p813_p9 = por %p62_p8, %p61_p7  ;;  %s51_s16 = ssub.s32 %s1071_s13, %s1073_s14 }
  0x22   : > { %p68_p11 = scmp.eq.s32.totalorder %s797_s28, 0  ;;  %p52_p12 = scmp.eq.s32.totalorder %s51_s16, 0 }
  0x23   : > { %s77_s17 = ssub.s32 %s710_s0, %s801_s30  ;;  %s80_s20 = sadd.s32 1, %s694_s24 }
  0x24   : > { %p822_p13 = por %p68_p11, %p67_p10  ;;  %p78_p0 = scmp.eq.s32.totalorder %s77_s17, 0 }
  0x25   : > { %s827_s19 = scalar_select %p52_p12, %s706_s27, %s54_s12  }
  0x26   : > { %p90_p1 = scmp.ne.s32.totalorder %s694_s24, %s690_s23  ;;  %p91_p2 = scmp.eq.s32.totalorder %s797_s28, 3 }
  0x27   : > { %1042 = sst [smem:[#allocation23_spill]] %s827_s19  ;;  %p96_p3 = scmp.ne.s32.totalorder %s690_s23, %s686_s22 }
  0x28   : > { %s833_s21 = scalar_select %p78_p0, %s694_s24, %s80_s20  }
  0x29   : > { %p97_p4 = scmp.eq.s32.totalorder %s388_s29, 3  ;;  %p840_p5 = por %p91_p2, %p90_p1 }
  0x2a   : > { %1043 = sst [smem:[#allocation24_spill]] %s833_s21  ;;  %p433_p6 = scmp.lt.s32.totalorder %s710_s0, 4 }
  0x2b   : > { %s1044_s25 = scalar_select %p840_p5, 1, 0 }
  0x2c   : > { %p845_p7 = por %p97_p4, %p96_p3  ;;  %s117_s5 = sand.u32 1, %s706_s27  }
  0x2d   : > { %s397_s6 = sshll.u32 %s117_s5, 3  ;;  %s401_s7 = sshll.u32 %s1071_s13, 7 }
  0x2e   : > { %s1045_s4 = scalar_select %p845_p7, 1, 0 }
  0x2f   : > { %s1046_s1 = sld [smem:[#allocation26_spill]]  ;;  %s121_s29 = scalar_lea.vmem [#allocation6], %s397_s6 }
  0x30   : > { %s140_s11 = sshll.u32 %s121_s29, 4  ;;  %p859_p8 = pnand %p433_p6, %p813_p9  ;;  %s855_s11 = int_to_ptr.vmem [resolvable:$true] %s140_s11 }
  0x31   : > { %s118_s13 = scalar_lea.sflag [#allocation7], %s117_s5 }
  0x32   : > { %p528_p0 = pneg %p859_p8 }
  0x35   : > { %s853_s10 = scalar_lea.hbm %s1046_s1, %s401_s7  ;;  %s531_s15 = scalar_lea.hbm %s1046_s1, 256 }
  0x36   : > { %s526_s14 = scalar_lea.hbm %s853_s10, 128  ;;  %p532_p9 = scmp.lt.u32.totalorder %s853_s10, %s1046_s1 }
  0x37   : > { %p527_p12 = scmp.ne.s32.totalorder %s853_s10, %s526_s14  ;;  %p533_p3 = scmp.lt.u32.totalorder %s531_s15, %s526_s14 }
  0x38   : > { %p535_p6 = scmp.lt.u32.totalorder %s526_s14, %s853_s10 }
  0x39   : > { %p529_p1 = pnand %p528_p0, %p527_p12  ;;  %p534_p4 = por %p533_p3, %p532_p9 }
  0x3b   : > { %p530_p2 = pneg %p529_p1  ;;  %p536_p10 = por %p535_p6, %p534_p4 }
  0x3d   : > { %p537_p11 = pnand %p536_p10, %p530_p2 }
  0x3f   : > { %540 = shalt.err (!%p537_p11)
}
  0x40   : > { %s541_s5 = scalar_lea.vmem %s855_s11, 128  ;;  %s725_s7 = smov [#allocation6]  }
  0x41   : > { %p542_p12 = scmp.ne.s32.totalorder %s855_s11, %s541_s5  ;;  %s546_s8 = sshll.u32 %s725_s7, 4  ;;  %s547_s8 = int_to_ptr.vmem [resolvable:$false] %s546_s8 }
  0x42   : > { %s548_s9 = scalar_lea.vmem %s547_s8, 256  ;;  %p549_p5 = scmp.lt.s32.totalorder %s855_s11, %s547_s8 }
  0x43   : > { %p544_p1 = pnand %p542_p12, %p528_p0  ;;  %p550_p9 = scmp.lt.s32.totalorder %s548_s9, %s541_s5 }
  0x45   : > { %p545_p7 = pneg %p544_p1  ;;  %p551_p3 = por %p550_p9, %p549_p5 }
  0x47   : > { %p552_p4 = pnand %p551_p3, %p545_p7 }
  0x49   : > { %555 = shalt.err (!%p552_p4)
}
  0x4a   : > { %428 = dma.hbm_to_vmem [thread:$0]  (!%p859_p8), %s853_s10, 128, %s855_s11, %s118_s13  }
  0x4b   : > { %p1048_p10 = scmp.lt.s32.totalorder %s710_s0, 5  ;;  %p1049_p11 = scmp.ge.s32.totalorder %s710_s0, 1 }
  0x4d   : > { %p146_p0 = pnand %p1049_p11, %p1048_p10 }
  0x4f   : > { %149 = sbr.rel (%p146_p0) target bundleno = 229 (0xe5), region = 24 }
  0x56   : > { %s151_s29 = sand.u32 1, %s702_s26  }
  0x57   : > { %s895_s14 = sshll.u32 %s151_s29, 3  ;;  %s152_s16 = scalar_lea.sflag [#allocation7], %s151_s29 }
  0x58   : > { %675 = dma.done.wait (%p822_p13), %s152_s16, 128  }
  0x59   : > { %677 = vsyncadd (%p822_p13), %s152_s16, 4294967168  ;;  %s1032_s10 = sand.u32 1, %s690_s23   ;;  %p186_p5 = scmp.lt.s32.totalorder %s797_s28, 0 }
  0x5a   : > { %s906_s11 = sshll.u32 %s1032_s10, 3  ;;  %s187_s12 = ssub.s32 0, %s797_s28 }
  0x5b   : > { %s405_s13 = smin.u32 %s797_s28, %s187_s12  ;;  %p406_p13 = scmp.ne.s32.totalorder %s797_s28, 0 }
  0x5c   : > { %s189_s15 = sand.u32 1, %s405_s13   ;;  %s914_s18 = smov (!%p406_p13), 0  }
  0x5d   : > { %s190_s20 = ssub.s32 0, %s189_s15  ;;  %195 = sbr.rel (%p406_p13) target bundleno = 139 (0x8b), region = 32 }
  0x5e   : > { %s1075_s20 = smov (!%p186_p5, %s190_s20), %s189_s15 }
  0x64 LB: >> { %s202_s5 = sld [smem:[#allocation5 + %s714_s18]]  ;;  %s205_s7 = scalar_lea.vmem [#allocation2], %s714_s18  ;;  %s714_s18 = sphi %s914_s18, %s201_s18  }
  0x65   : >> { %s213_s8 = sshll.u32 %s205_s7, 4  ;;  %s558_s6 = scalar_lea.hbm %s1029_s2, 1024  ;;  %s214_s8 = int_to_ptr.vmem [resolvable:$true] %s213_s8 }
  0x6a   : >> { %s407_s9 = sshll.u32 %s202_s5, 4 }
  0x6b   : >> { %s204_s12 = scalar_lea.hbm %s1029_s2, %s407_s9 }
  0x6c   : >> { %s556_s13 = scalar_lea.hbm %s204_s12, 16  ;;  %p559_p8 = scmp.lt.u32.totalorder %s204_s12, %s1029_s2 }
  0x6d   : >> { %p557_p7 = scmp.ne.s32.totalorder %s204_s12, %s556_s13  ;;  %p560_p2 = scmp.lt.u32.totalorder %s558_s6, %s556_s13 }
  0x6e   : >> { %p562_p12 = scmp.lt.u32.totalorder %s556_s13, %s204_s12 }
  0x6f   : >> { %p561_p6 = por %p560_p2, %p559_p8 }
  0x71   : >> { %p563_p1 = por %p562_p12, %p561_p6 }
  0x73   : >> { %p564_p9 = pnand %p563_p1, %p557_p7 }
  0x75   : >> { %567 = shalt.err (!%p564_p9)  }
  0x76   : >> { %s568_s5 = scalar_lea.vmem %s214_s8, 16  ;;  %s726_s7 = smov [#allocation2]  }
  0x77   : >> { %p569_p3 = scmp.ne.s32.totalorder %s214_s8, %s568_s5  ;;  %s570_s9 = sshll.u32 %s726_s7, 4  ;;  %s571_s9 = int_to_ptr.vmem [resolvable:$false] %s570_s9 }
  0x78   : >> { %s572_s29 = scalar_lea.vmem %s571_s9, 256  ;;  %p573_p4 = scmp.lt.s32.totalorder %s214_s8, %s571_s9 }
  0x79   : >> { %p574_p10 = scmp.lt.s32.totalorder %s572_s29, %s568_s5 }
  0x7b   : >> { %p575_p11 = por %p574_p10, %p573_p4 }
  0x7d   : >> { %p576_p0 = pnand %p575_p11, %p569_p3 }
  0x7f   : >> { %579 = shalt.err (!%p576_p0)  }
  0x80   : >> { %216 = dma.hbm_to_vmem [thread:$0]  %s204_s12, 16, %s214_s8, [#allocation3] }
  0x81   : >> { %s201_s18 = sadd.s32 1, %s714_s18  }
  0x82   : >> { %p198_p5 = scmp.ge.s32.totalorder %s201_s18, 8  }
  0x84   : > { %200 = sbr.rel (!%p198_p5) target bundleno = 100 (0x64), region = 114 }
  0x8b PF: > { %s217_s1 = sadd.s32 1, %s797_s28 }
  0x8c   : > { %p408_p13 = scmp.ge.s32.totalorder %s217_s1, 4 }
  0x8d   : > { %s222_s17 = ssub.s32 (!%p408_p13), 1, %s1075_s20  ;;  %s419_s10 = sshll.u32 (!%p408_p13), %s797_s28, 3 }
  0x8e   : > { %221 = sbr.rel (%p408_p13) target bundleno = 195 (0xc3), region = 47  ;;  %s936_s6 = sadd.s32 (!%p408_p13), 8, %s419_s10 }
  0x8f   : > { %1050 = sst [smem:[#allocation25_spill]] (!%p408_p13), %s936_s6  ;;  %s938_s16 = smov (!%p408_p13), 0  }
  0x95 LB: >> { %s1051_s6 = sld [smem:[#allocation25_spill]]  ;;  %s411_s18 = sshll.u32 %s222_s17, 3  ;;  %s718_s16 = sphi %s938_s16, %s229_s16  }
  0x96   : >> { %s235_s12 = sadd.s32 %s718_s16, %s411_s18  ;;  %s237_s10 = scalar_lea.sflag [#allocation3], %s222_s17 }
  0x97   : >> { %s236_s15 = scalar_lea.vmem [#allocation2], %s235_s12  ;;  %s582_s21 = scalar_lea.hbm %s1029_s2, 1024 }
  0x98   : >> { %s245_s5 = sshll.u32 %s236_s15, 4  ;;  %s246_s5 = int_to_ptr.vmem [resolvable:$true] %s245_s5 }
  0x9b   : >> { %s230_s8 = sadd.s32 %s718_s16, %s1051_s6 }
  0x9c   : >> { %s231_s13 = sld [smem:[#allocation5 + %s230_s8]] }
  0xa2   : >> { %s410_s7 = sshll.u32 %s231_s13, 4 }
  0xa3   : >> { %s233_s1 = scalar_lea.hbm %s1029_s2, %s410_s7 }
  0xa4   : >> { %s580_s19 = scalar_lea.hbm %s233_s1, 16  ;;  %p583_p8 = scmp.lt.u32.totalorder %s233_s1, %s1029_s2 }
  0xa5   : >> { %p581_p7 = scmp.ne.s32.totalorder %s233_s1, %s580_s19  ;;  %p584_p2 = scmp.lt.u32.totalorder %s582_s21, %s580_s19 }
  0xa6   : >> { %p586_p12 = scmp.lt.u32.totalorder %s580_s19, %s233_s1 }
  0xa7   : >> { %p585_p6 = por %p584_p2, %p583_p8 }
  0xa9   : >> { %p587_p1 = por %p586_p12, %p585_p6 }
  0xab   : >> { %p588_p9 = pnand %p587_p1, %p581_p7 }
  0xad   : >> { %591 = shalt.err (!%p588_p9)  }
  0xae   : >> { %s592_s18 = scalar_lea.vmem %s246_s5, 16  ;;  %s727_s8 = smov [#allocation2]  }
  0xaf   : >> { %p593_p3 = scmp.ne.s32.totalorder %s246_s5, %s592_s18  ;;  %s594_s12 = sshll.u32 %s727_s8, 4  ;;  %s595_s12 = int_to_ptr.vmem [resolvable:$false] %s594_s12 }
  0xb0   : >> { %s596_s13 = scalar_lea.vmem %s595_s12, 256  ;;  %p597_p4 = scmp.lt.s32.totalorder %s246_s5, %s595_s12 }
  0xb1   : >> { %p598_p10 = scmp.lt.s32.totalorder %s596_s13, %s592_s18 }
  0xb3   : >> { %p599_p11 = por %p598_p10, %p597_p4 }
  0xb5   : >> { %p600_p0 = pnand %p599_p11, %p593_p3 }
  0xb7   : >> { %603 = shalt.err (!%p600_p0)  }
  0xb8   : >> { %248 = dma.hbm_to_vmem [thread:$0]  %s233_s1, 16, %s246_s5, %s237_s10 }
  0xb9   : >> { %s229_s16 = sadd.s32 1, %s718_s16  }
  0xba   : >> { %p226_p5 = scmp.ge.s32.totalorder %s229_s16, 8  }
  0xbc   : > { %228 = sbr.rel (!%p226_p5) target bundleno = 149 (0x95), region = 125 }
  0xc3 PF: > { %s720_s24 = smov 0  }
  0xc4 LB: >> { %s255_s26 = scalar_lea.sflag [#allocation3], %s1075_s20  ;;  %s722_s24 = sphi %s720_s24, %s254_s24  }
  0xc5   : >> { %678 = dma.done.wait %s255_s26, 16 }
  0xc6   : >> { %679 = vsyncadd %s255_s26, 4294967280  ;;  %s254_s24 = sadd.s32 1, %s722_s24  }
  0xc7   : >> { %p251_p13 = scmp.ge.s32.totalorder %s254_s24, 8  }
  0xc8   : > { %s412_s27 = sshll.u32 (%p251_p13), %s1075_s20, 3  ;;  %s1052_s19 = scalar_lea.vmem (%p251_p13), [#allocation6], %s895_s14 }
  0xc9   : > { %253 = sbr.rel (!%p251_p13) target bundleno = 196 (0xc4), region = 136  ;;  %v261_v0 = vld [vmem:[%s1052_s19] sm:$0xff] (%p251_p13)  ;;  %s414_s21 = sshll.u32 (%p251_p13), %s797_s28, 7 }
  0xca   : > { %s259_s17 = scalar_lea.vmem (%p251_p13), [#allocation2], %s412_s27  ;;  %s1053_s6 = scalar_lea.vmem (%p251_p13), [#allocation9], %s906_s11 }
  0xcb   : > { %v260_v1 = vld [vmem:[%s259_s17] sm:$0xff] (%p251_p13)  ;;  %s278_s16 = sshll.u32 (%p251_p13), %s1053_s6, 4  ;;  %s972_s7 = scalar_lea.hbm (%p251_p13), %s1030_s3, %s414_s21  ;;  %s974_s16 = int_to_ptr.vmem [resolvable:$true] %s278_s16 }
  0xcc   : > { %v262_v2 = vadd.f32 (%p251_p13), %v261_v0, %v260_v1  ;;  %s1054_s9 = smov (%p251_p13), %s1053_s6  ;;  %s1055_s14 = sand.u32 (%p251_p13), 1, %s690_s23  }
  0xcd   : > { %s265_s20 = scalar_lea.sflag (%p251_p13), [#allocation8], %s1055_s14  ;;  %s604_s28 = scalar_lea.vmem (%p251_p13), %s974_s16, 128 }
  0xce   : > { %263 = vst [vmem:[%s1054_s9] sm:$0xff] (%p251_p13), %v262_v2  ;;  %p605_p7 = scmp.ne.s32.totalorder (%p251_p13), %s974_s16, %s604_s28  ;;  %p1056_p8 = scmp.ne.s32.totalorder (%p251_p13), %s1044_s25, 0 }
  0xcf   : > { %s728_s29 = smov (%p251_p13), [#allocation9]  }
  0xd0   : > { %p606_p2 = pnand %p605_p7, %p1056_p8  ;;  %s608_s1 = sshll.u32 %s728_s29, 4  ;;  %s609_s1 = int_to_ptr.vmem [resolvable:$false] %s608_s1 }
  0xd1   : > { %s610_s10 = scalar_lea.vmem %s609_s1, 256  ;;  %p611_p12 = scmp.lt.s32.totalorder %s974_s16, %s609_s1 }
  0xd2   : > { %p607_p6 = pneg %p606_p2  ;;  %p612_p1 = scmp.lt.s32.totalorder %s610_s10, %s604_s28 }
  0xd4   : > { %p613_p9 = por %p612_p1, %p611_p12 }
  0xd6   : > { %p614_p3 = pnand %p613_p9, %p607_p6 }
  0xd8   : > { %617 = shalt.err (!%p614_p3)
}
  0xd9   : > { %s618_s11 = scalar_lea.hbm %s972_s7, 128  ;;  %s622_s12 = scalar_lea.hbm %s1030_s3, 512 }
  0xda   : > { %p619_p4 = scmp.ne.s32.totalorder %s972_s7, %s618_s11  ;;  %p623_p0 = scmp.lt.u32.totalorder %s972_s7, %s1030_s3 }
  0xdb   : > { %p624_p5 = scmp.lt.u32.totalorder %s622_s12, %s618_s11  ;;  %p626_p7 = scmp.lt.u32.totalorder %s618_s11, %s972_s7 }
  0xdc   : > { %p620_p10 = pnand %p619_p4, %p1056_p8 }
  0xdd   : > { %p625_p13 = por %p624_p5, %p623_p0 }
  0xde   : > { %p621_p11 = pneg %p620_p10 }
  0xdf   : > { %p627_p2 = por %p626_p7, %p625_p13 }
  0xe1   : > { %p628_p6 = pnand %p627_p2, %p621_p11 }
  0xe3   : > { %631 = shalt.err (!%p628_p6)
}
  0xe4   : > { %423 = dma.vmem_to_hbm [thread:$0]  (%p1056_p8), %s974_s16, 128, %s972_s7, %s265_s20  }
  0xe5 PF: > { %p434_p12 = scmp.ge.s32.totalorder %s710_s0, 2  ;;  %s290_s26 = sand.u32 1, %s686_s22  }
  0xe6   : > { %p1057_p1 = scmp.ne.s32.totalorder %s1045_s4, 0  ;;  %s291_s27 = scalar_lea.sflag [#allocation8], %s290_s26 }
  0xe8   : > { %p430_p9 = pnand %p434_p12, %p1057_p1 }
  0xea   : > { %681 = dma.done.wait (!%p430_p9), %s291_s27, 128  }
  0xeb   : > { %683 = vsyncadd (!%p430_p9), %s291_s27, 4294967168  ;;  %s1058_s19 = sld [smem:[#allocation20_spill]]  ;;  %s1059_s24 = sld [smem:[#allocation24_spill]] }
  0xec   : > { %s1060_s25 = sld [smem:[#allocation21_spill]]  ;;  %s1061_s26 = sld [smem:[#allocation22_spill]] }
  0xed   : > { %s1062_s27 = sld [smem:[#allocation23_spill]]  ;;  %p20_p8 = scmp.ge.s32.totalorder %s801_s30, 6  }
  0xee   : > { %s1063_s22 = smov %s690_s23  ;;  %s1065_s0 = smov %s801_s30 }
  0xef   :  { %22 = sbr.rel (!%p20_p8) target bundleno = 19 (0x13), region = 147 }
  0xf1   : > { %s1064_s23 = smov %s1058_s19 }
  0xf6   :  { %296 = vsyncpa [#allocation7], 1 }
  0xf7   :  { %298 = vsyncpa [#allocation7 + $0x1], 1 }
  0xf8   :  { %299 = vsyncpa [#allocation8], 1 }
  0xf9   :  { %301 = vsyncpa [#allocation8 + $0x1], 1 }
  0xfa   :  { %302 = vsyncmov [#allocation3] }
  0xfd   :  { %s303_s0 = vpop.sfrf %302 }
  0xfe   :  { %p417_p3 = scmp.ne.s32.totalorder %s303_s0, 0 }
 0x100   :  { %307 = shalt.err (%p417_p3)  }
 0x101   :  { %309 = vsyncmov [#allocation3 + $0x1] }
 0x104   :  { %s310_s4 = vpop.sfrf %309 }
 0x105   :  { %p418_p4 = scmp.ne.s32.totalorder %s310_s4, 0 }
 0x107   :  { %314 = shalt.err (%p418_p4)  }

</bundles_post_ra>
